<compile_context>
chip_gen: v5e
topology: v5e:2x2
jax: 0.10.0
libtpu: 0.0.40
codegen_flags: <defaults>
</compile_context>

<pallas_src>
import functools

import jax
import jax.numpy as jnp
import numpy as np
from jax import lax
from jax.experimental import pallas as pl
from jax.experimental.pallas import tpu as pltpu


# ------------------------------ fused kernel --------------------------------

def _fused_kernel(x0_ref, x1_ref, x2_ref, w0_ref, w1_ref, w2_ref, b_ref,
                  o_ref, *, th, w):
    """One grid step = `th` output H-rows (full W) of one image.

    x0_ref: (th * w,      C0)   finest level, pixels flattened row-major
    x1_ref: (th//2 * w,   C1)   mid level   (already W-replicated x2)
    x2_ref: (th//4 * w,   C2)   coarse level (already W-replicated x4)
    w*_ref: (C*, F) 1x1-conv weights,  b_ref: (1, F) summed bias (f32)
    o_ref : (th * w, F)
    """
    f32 = jnp.float32
    align = 16 if (w % 16 == 0) else 8      # sublane alignment hint
    bias = b_ref[...].astype(f32)           # (1, F)

    def quad(q, carry):
        # One coarse (x2) row-group feeds 4 output row-groups; each mid (x1)
        # row-group feeds 2.  Bias is folded into the coarse dot so every
        # output row-group costs: 1 dot + 1 add + 1 max + 1 lane-dense store.
        r2 = pl.multiple_of(q * w, align)
        y2 = jnp.dot(x2_ref[pl.ds(r2, w), :], w2_ref[...],
                     preferred_element_type=f32) + bias              # (w, F)
        for half in range(2):
            r1 = pl.multiple_of((2 * q + half) * w, align)
            s12 = jnp.dot(x1_ref[pl.ds(r1, w), :], w1_ref[...],
                          preferred_element_type=f32) + y2           # (w, F)
            for sub in range(2):
                r0 = pl.multiple_of((4 * q + 2 * half + sub) * w, align)
                y0 = jnp.dot(x0_ref[pl.ds(r0, w), :], w0_ref[...],
                             preferred_element_type=f32)
                o_ref[pl.ds(r0, w), :] = jnp.maximum(
                    y0 + s12, 0.0).astype(o_ref.dtype)
        return carry

    lax.fori_loop(0, th // 4, quad, 0, unroll=2)


# ------------------------------ tile picking ---------------------------------

def _physical_vmem_bytes():
    """Per-TensorCore VMEM capacity (128 MiB v5e/v6e, 64 MiB v7x)."""
    try:
        cap = int(pltpu.get_tpu_info().vmem_capacity_bytes)
        if cap > 0:
            return cap
    except Exception:
        pass
    return 64 * 1024 * 1024      # conservative fallback (v7x per-TC)


def _pick_tile_h(n, h, w, channels, f, itemsize, block_budget,
                 *, out_block_cap=8 << 20, min_grid=4):
    """Largest H-tile that divides H, is a multiple of 4, keeps the full
    per-step VMEM footprint (double-buffered in+out blocks, lane-padded
    narrow-channel inputs, live f32 temporaries) within `block_budget`,
    keeps the output block <= out_block_cap (per-step overhead is fully
    amortized by ~4-8 MiB), and preferably leaves >= min_grid grid steps
    so the pipeline (and v7x's two TensorCores) has work to overlap."""
    if h % 4 != 0:
        raise ValueError("PyramidFeatures Pallas kernel requires H % 4 == 0")
    cands = [t for t in range(4, h + 1, 4) if h % t == 0]
    c0, c1, c2 = channels

    def lane_pad(c):
        return ((c + 127) // 128) * 128     # narrow channels pad to 128 lanes

    def vmem_bytes(t):
        out_b = t * w * f * itemsize
        in_b = w * itemsize * (t * lane_pad(c0)
                               + (t // 2) * lane_pad(c1)
                               + (t // 4) * lane_pad(c2))
        wgt_b = (c0 + c1 + c2 + 8) * f * 4        # weights + bias (f32 bound)
        temps = 4 * w * f * 4                     # live f32 vregs in epilogue
        return 2 * (out_b + in_b + wgt_b) + temps  # x2: double-buffering

    def fits(t):
        return (vmem_bytes(t) <= block_budget
                and t * w * f * itemsize <= out_block_cap)

    def enough_grid(t):
        return n * (h // t) >= min_grid

    sel = [t for t in cands if fits(t) and enough_grid(t)]
    if sel:
        return max(sel)
    sel = [t for t in cands if fits(t)]
    if sel:
        return max(sel)
    return min(cands)


# ------------------------------ wrapper --------------------------------------

def pyramid_features(x0, x1, x2, params):
    """Pallas implementation of PyramidFeatures.forward, NHWC tensors."""
    n, h, w, c0 = x0.shape
    c1 = x1.shape[-1]
    c2 = x2.shape[-1]
    f = params["w0"].shape[1]
    assert x1.shape == (n, h // 2, w // 2, c1)
    assert x2.shape == (n, h // 4, w // 4, c2)
    itemsize = jnp.dtype(x0.dtype).itemsize
    min_w = 8 if itemsize >= 4 else 16           # sublane packing for bf16
    assert h % 4 == 0 and w % min_w == 0, (
        "need H % 4 == 0 and W %% %d == 0" % min_w)

    # Lane-dense output: pad F to a multiple of 128 (masked partial stores are
    # one of the largest measured single-lever perf cliffs).
    f_pad = ((f + 127) // 128) * 128
    w0, w1, w2 = params["w0"], params["w1"], params["w2"]
    bsum = (params["b0"].astype(jnp.float32)
            + params["b1"].astype(jnp.float32)
            + params["b2"].astype(jnp.float32)).reshape(1, f)
    if f_pad != f:
        pad = ((0, 0), (0, f_pad - f))
        w0 = jnp.pad(w0, pad)
        w1 = jnp.pad(w1, pad)
        w2 = jnp.pad(w2, pad)
        bsum = jnp.pad(bsum, pad)

    # W-axis nearest-neighbour replication on the raw, low-channel inputs
    # (16/32 channels) -- cheap XLA op; all F=big-channel work stays fused.
    # TODO(synk): fuse this sublane-repeat into the kernel (~10% less HBM
    # traffic) once jnp.repeat-along-sublanes is verified to lower on Mosaic.
    x1w = jnp.repeat(x1, 2, axis=2)                    # (n, h//2, w, c1)
    x2w = jnp.repeat(x2, 4, axis=2)                    # (n, h//4, w, c2)

    # Flatten pixels row-major into 2D matmul operands (metadata-only).
    x0f = x0.reshape(n * h * w, c0)
    x1f = x1w.reshape(n * (h // 2) * w, c1)
    x2f = x2w.reshape(n * (h // 4) * w, c2)

    # Generation-aware VMEM budget: 3/4 of physical per-TC VMEM
    # (96 MiB on v5e/v6e, 48 MiB on v7x), with headroom for compiler scratch.
    vmem_cap = _physical_vmem_bytes()
    vmem_limit = min((vmem_cap * 3) // 4, 96 * 1024 * 1024)
    block_budget = (vmem_limit * 7) // 8

    th = _pick_tile_h(n, h, w, (c0, c1, c2), f_pad, itemsize, block_budget)
    nblk = n * (h // th)
    m0, m1, m2 = th * w, (th // 2) * w, (th // 4) * w

    kernel = functools.partial(_fused_kernel, th=th, w=w)

    # Advisory cost hint: memory-bound pointwise-conv + add + relu.
    flops = (2 * f_pad * (n * h * w * c0 + n * (h // 2) * w * c1
                          + n * (h // 4) * w * c2)
             + 4 * n * h * w * f_pad)
    bytes_accessed = itemsize * (
        n * h * w * c0 + n * (h // 2) * w * c1 + n * (h // 4) * w * c2
        + n * h * w * f_pad) + 4 * ((c0 + c1 + c2) * f_pad + f_pad)
    cost = pl.CostEstimate(flops=flops, transcendentals=0,
                           bytes_accessed=bytes_accessed)

    out = pl.pallas_call(
        kernel,
        out_shape=jax.ShapeDtypeStruct((n * h * w, f_pad), x0.dtype),
        grid_spec=pltpu.PrefetchScalarGridSpec(
            num_scalar_prefetch=0,
            grid=(nblk,),
            in_specs=[
                pl.BlockSpec((m0, c0), lambda i: (i, 0)),
                pl.BlockSpec((m1, c1), lambda i: (i, 0)),
                pl.BlockSpec((m2, c2), lambda i: (i, 0)),
                pl.BlockSpec((c0, f_pad), lambda i: (0, 0)),
                pl.BlockSpec((c1, f_pad), lambda i: (0, 0)),
                pl.BlockSpec((c2, f_pad), lambda i: (0, 0)),
                pl.BlockSpec((1, f_pad), lambda i: (0, 0)),
            ],
            out_specs=pl.BlockSpec((m0, f_pad), lambda i: (i, 0)),
        ),
        compiler_params=pltpu.CompilerParams(
            dimension_semantics=("parallel",),          # megacore / v7x 2xTC
            vmem_limit_bytes=vmem_limit),
        cost_estimate=cost,
    )(x0f, x1f, x2f, w0, w1, w2, bsum)

    out = out.reshape(n, h, w, f_pad)
    if f_pad != f:
        out = out[..., :f]
    return out


# --------------------------- pure-JAX reference ------------------------------

def pyramid_features_ref(x0, x1, x2, params):
    def conv(x, wgt, b):
        n, h, wd, c = x.shape
        return (x.reshape(-1, c) @ wgt + b).reshape(n, h, wd, -1)

    def up2(x):  # nearest, scale_factor=2 (matches PyTorch op order exactly)
        return jnp.repeat(jnp.repeat(x, 2, axis=1), 2, axis=2)

    x0c = conv(x0, params["w0"], params["b0"])
    x1c = conv(x1, params["w1"], params["b1"])
    x2c = conv(x2, params["w2"], params["b2"])
    s = x1c + up2(x2c)
    s = up2(s)
    return jnp.maximum(s + x0c, 0.0)


# --------------------------------- main ---------------------------------------

if __name__ == "__main__":
    # x0 = finest level, x1 = 2x coarser, x2 = 4x coarser (as in the module).
    N = 2
    H = W = 16
    C0, C1, C2 = 8, 16, 32        # x0_size, x1_size, x2_size
    F = 256                       # feature_size (module default, lane-aligned)

    key = jax.random.PRNGKey(0)
    k = jax.random.split(key, 9)

    x0 = jax.random.normal(k[0], (N, H, W, C0), jnp.float32)
    x1 = jax.random.normal(k[1], (N, H // 2, W // 2, C1), jnp.float32)
    x2 = jax.random.normal(k[2], (N, H // 4, W // 4, C2), jnp.float32)

    # Conv2d 1x1 weights stored as (Cin, F).
    params = {
        "w0": jax.random.normal(k[3], (C0, F), jnp.float32) / np.sqrt(C0),
        "b0": jax.random.normal(k[4], (F,), jnp.float32) * 0.01,
        "w1": jax.random.normal(k[5], (C1, F), jnp.float32) / np.sqrt(C1),
        "b1": jax.random.normal(k[6], (F,), jnp.float32) * 0.01,
        "w2": jax.random.normal(k[7], (C2, F), jnp.float32) / np.sqrt(C2),
        "b2": jax.random.normal(k[8], (F,), jnp.float32) * 0.01,
    }

    ref = pyramid_features_ref(x0, x1, x2, params)

    # f32 path: tight check against the pure-JAX reference.
    out = jax.block_until_ready(pyramid_features(x0, x1, x2, params))
    np.testing.assert_allclose(np.asarray(out), np.asarray(ref),
                               rtol=1e-5, atol=1e-5)
    assert out.shape == (N, H, W, F)

    # bf16 I/O path (recommended for inference: halves the dominant HBM term);
    # accumulation stays f32 in-kernel, so only cast/rounding error remains.
    params_bf16 = dict(params,
                       w0=params["w0"].astype(jnp.bfloat16),
                       w1=params["w1"].astype(jnp.bfloat16),
                       w2=params["w2"].astype(jnp.bfloat16))
    out_bf16 = jax.block_until_ready(
        pyramid_features(x0.astype(jnp.bfloat16), x1.astype(jnp.bfloat16),
                         x2.astype(jnp.bfloat16), params_bf16))
    np.testing.assert_allclose(np.asarray(out_bf16.astype(jnp.float32)),
                               np.asarray(ref), rtol=1e-1, atol=1e-1)

    print("KERNEL_OK")
</pallas_src>

<mosaic_0001>
module attributes {stable_mosaic.version = 11 : i64} {
  func.func @_fused_kernel(%arg0: i32, %arg1: memref<128x8xf32, #tpu.memory_space<vmem>>, %arg2: memref<64x16xf32, #tpu.memory_space<vmem>>, %arg3: memref<32x32xf32, #tpu.memory_space<vmem>>, %arg4: memref<8x256xf32, #tpu.memory_space<vmem>>, %arg5: memref<16x256xf32, #tpu.memory_space<vmem>>, %arg6: memref<32x256xf32, #tpu.memory_space<vmem>>, %arg7: memref<1x256xf32, #tpu.memory_space<vmem>>, %arg8: memref<128x256xf32, #tpu.memory_space<vmem>>) attributes {dimension_semantics = [#tpu.dimension_semantics<parallel>], iteration_bounds = array<i64: 4>, scalar_prefetch = 0 : i64, scratch_operands = 0 : i64, tpu.core_type = #tpu.core_type<tc>, window_params = [{transform_indices = @transform_0, window_bounds = array<i64: 128, 8>}, {transform_indices = @transform_1, window_bounds = array<i64: 64, 16>}, {transform_indices = @transform_2, window_bounds = array<i64: 32, 32>}, {pipeline_mode = #tpu.pipeline_mode<synchronous>, transform_indices = @transform_3, window_bounds = array<i64: 8, 256>}, {pipeline_mode = #tpu.pipeline_mode<synchronous>, transform_indices = @transform_4, window_bounds = array<i64: 16, 256>}, {pipeline_mode = #tpu.pipeline_mode<synchronous>, transform_indices = @transform_5, window_bounds = array<i64: 32, 256>}, {pipeline_mode = #tpu.pipeline_mode<synchronous>, transform_indices = @transform_6, window_bounds = array<i64: 1, 256>}, {transform_indices = @transform_7, window_bounds = array<i64: 128, 256>}]} {
    %c0 = arith.constant 0 : index
    %c0_0 = arith.constant 0 : index
    %0 = vector.load %arg7[%c0, %c0_0] : memref<1x256xf32, #tpu.memory_space<vmem>>, vector<1x256xf32>
    %c0_i32 = arith.constant 0 : i32
    %c16_i32 = arith.constant 16 : i32
    %1 = arith.muli %c0_i32, %c16_i32 : i32
    %2 = tpu.assume_multiple %1, 16 : i32
    %3 = arith.index_cast %2 : i32 to index
    %c0_1 = arith.constant 0 : index
    %4 = vector.load %arg3[%3, %c0_1] : memref<32x32xf32, #tpu.memory_space<vmem>>, vector<16x32xf32>
    %c0_2 = arith.constant 0 : index
    %c0_3 = arith.constant 0 : index
    %5 = vector.load %arg6[%c0_2, %c0_3] : memref<32x256xf32, #tpu.memory_space<vmem>>, vector<32x256xf32>
    %cst = arith.constant dense<0.000000e+00> : vector<16x256xf32>
    %6 = tpu.matmul %4, %5, %cst {dimension_numbers = #tpu.dot_dimension_numbers<[1], [0], [0], [1], [0, 0, 1, 1], [], []>} : vector<16x32xf32>, vector<32x256xf32>, vector<16x256xf32> -> vector<16x256xf32>
    %7 = vector.broadcast %0 : vector<1x256xf32> to vector<16x256xf32>
    %8 = arith.addf %6, %7 : vector<16x256xf32>
    %c2_i32 = arith.constant 2 : i32
    %9 = arith.muli %c2_i32, %c0_i32 : i32
    %c0_i32_4 = arith.constant 0 : i32
    %10 = arith.addi %9, %c0_i32_4 : i32
    %c16_i32_5 = arith.constant 16 : i32
    %11 = arith.muli %10, %c16_i32_5 : i32
    %12 = tpu.assume_multiple %11, 16 : i32
    %13 = arith.index_cast %12 : i32 to index
    %c0_6 = arith.constant 0 : index
    %14 = vector.load %arg2[%13, %c0_6] : memref<64x16xf32, #tpu.memory_space<vmem>>, vector<16x16xf32>
    %c0_7 = arith.constant 0 : index
    %c0_8 = arith.constant 0 : index
    %15 = vector.load %arg5[%c0_7, %c0_8] : memref<16x256xf32, #tpu.memory_space<vmem>>, vector<16x256xf32>
    %cst_9 = arith.constant dense<0.000000e+00> : vector<16x256xf32>
    %16 = tpu.matmul %14, %15, %cst_9 {dimension_numbers = #tpu.dot_dimension_numbers<[1], [0], [0], [1], [0, 0, 1, 1], [], []>} : vector<16x16xf32>, vector<16x256xf32>, vector<16x256xf32> -> vector<16x256xf32>
    %17 = arith.addf %16, %8 : vector<16x256xf32>
    %c4_i32 = arith.constant 4 : i32
    %18 = arith.muli %c4_i32, %c0_i32 : i32
    %c0_i32_10 = arith.constant 0 : i32
    %19 = arith.addi %18, %c0_i32_10 : i32
    %c0_i32_11 = arith.constant 0 : i32
    %20 = arith.addi %19, %c0_i32_11 : i32
    %c16_i32_12 = arith.constant 16 : i32
    %21 = arith.muli %20, %c16_i32_12 : i32
    %22 = tpu.assume_multiple %21, 16 : i32
    %23 = arith.index_cast %22 : i32 to index
    %c0_13 = arith.constant 0 : index
    %24 = vector.load %arg1[%23, %c0_13] : memref<128x8xf32, #tpu.memory_space<vmem>>, vector<16x8xf32>
    %c0_14 = arith.constant 0 : index
    %c0_15 = arith.constant 0 : index
    %25 = vector.load %arg4[%c0_14, %c0_15] : memref<8x256xf32, #tpu.memory_space<vmem>>, vector<8x256xf32>
    %cst_16 = arith.constant dense<0.000000e+00> : vector<16x256xf32>
    %26 = tpu.matmul %24, %25, %cst_16 {dimension_numbers = #tpu.dot_dimension_numbers<[1], [0], [0], [1], [0, 0, 1, 1], [], []>} : vector<16x8xf32>, vector<8x256xf32>, vector<16x256xf32> -> vector<16x256xf32>
    %27 = arith.addf %26, %17 : vector<16x256xf32>
    %cst_17 = arith.constant 0.000000e+00 : f32
    %28 = vector.broadcast %cst_17 : f32 to vector<16x256xf32>
    %29 = arith.maximumf %27, %28 : vector<16x256xf32>
    %30 = arith.index_cast %22 : i32 to index
    %c0_18 = arith.constant 0 : index
    %31 = vector.load %arg8[%30, %c0_18] : memref<128x256xf32, #tpu.memory_space<vmem>>, vector<16x256xf32>
    tpu.vector_store %arg8[%30, %c0_18], %29 {strides = array<i32>} : memref<128x256xf32, #tpu.memory_space<vmem>>, vector<16x256xf32>,
    %c4_i32_19 = arith.constant 4 : i32
    %32 = arith.muli %c4_i32_19, %c0_i32 : i32
    %c0_i32_20 = arith.constant 0 : i32
    %33 = arith.addi %32, %c0_i32_20 : i32
    %c1_i32 = arith.constant 1 : i32
    %34 = arith.addi %33, %c1_i32 : i32
    %c16_i32_21 = arith.constant 16 : i32
    %35 = arith.muli %34, %c16_i32_21 : i32
    %36 = tpu.assume_multiple %35, 16 : i32
    %37 = arith.index_cast %36 : i32 to index
    %c0_22 = arith.constant 0 : index
    %38 = vector.load %arg1[%37, %c0_22] : memref<128x8xf32, #tpu.memory_space<vmem>>, vector<16x8xf32>
    %c0_23 = arith.constant 0 : index
    %c0_24 = arith.constant 0 : index
    %39 = vector.load %arg4[%c0_23, %c0_24] : memref<8x256xf32, #tpu.memory_space<vmem>>, vector<8x256xf32>
    %cst_25 = arith.constant dense<0.000000e+00> : vector<16x256xf32>
    %40 = tpu.matmul %38, %39, %cst_25 {dimension_numbers = #tpu.dot_dimension_numbers<[1], [0], [0], [1], [0, 0, 1, 1], [], []>} : vector<16x8xf32>, vector<8x256xf32>, vector<16x256xf32> -> vector<16x256xf32>
    %41 = arith.addf %40, %17 : vector<16x256xf32>
    %cst_26 = arith.constant 0.000000e+00 : f32
    %42 = vector.broadcast %cst_26 : f32 to vector<16x256xf32>
    %43 = arith.maximumf %41, %42 : vector<16x256xf32>
    %44 = arith.index_cast %36 : i32 to index
    %c0_27 = arith.constant 0 : index
    %45 = vector.load %arg8[%44, %c0_27] : memref<128x256xf32, #tpu.memory_space<vmem>>, vector<16x256xf32>
    tpu.vector_store %arg8[%44, %c0_27], %43 {strides = array<i32>} : memref<128x256xf32, #tpu.memory_space<vmem>>, vector<16x256xf32>,
    %c2_i32_28 = arith.constant 2 : i32
    %46 = arith.muli %c2_i32_28, %c0_i32 : i32
    %c1_i32_29 = arith.constant 1 : i32
    %47 = arith.addi %46, %c1_i32_29 : i32
    %c16_i32_30 = arith.constant 16 : i32
    %48 = arith.muli %47, %c16_i32_30 : i32
    %49 = tpu.assume_multiple %48, 16 : i32
    %50 = arith.index_cast %49 : i32 to index
    %c0_31 = arith.constant 0 : index
    %51 = vector.load %arg2[%50, %c0_31] : memref<64x16xf32, #tpu.memory_space<vmem>>, vector<16x16xf32>
    %c0_32 = arith.constant 0 : index
    %c0_33 = arith.constant 0 : index
    %52 = vector.load %arg5[%c0_32, %c0_33] : memref<16x256xf32, #tpu.memory_space<vmem>>, vector<16x256xf32>
    %cst_34 = arith.constant dense<0.000000e+00> : vector<16x256xf32>
    %53 = tpu.matmul %51, %52, %cst_34 {dimension_numbers = #tpu.dot_dimension_numbers<[1], [0], [0], [1], [0, 0, 1, 1], [], []>} : vector<16x16xf32>, vector<16x256xf32>, vector<16x256xf32> -> vector<16x256xf32>
    %54 = arith.addf %53, %8 : vector<16x256xf32>
    %c4_i32_35 = arith.constant 4 : i32
    %55 = arith.muli %c4_i32_35, %c0_i32 : i32
    %c2_i32_36 = arith.constant 2 : i32
    %56 = arith.addi %55, %c2_i32_36 : i32
    %c0_i32_37 = arith.constant 0 : i32
    %57 = arith.addi %56, %c0_i32_37 : i32
    %c16_i32_38 = arith.constant 16 : i32
    %58 = arith.muli %57, %c16_i32_38 : i32
    %59 = tpu.assume_multiple %58, 16 : i32
    %60 = arith.index_cast %59 : i32 to index
    %c0_39 = arith.constant 0 : index
    %61 = vector.load %arg1[%60, %c0_39] : memref<128x8xf32, #tpu.memory_space<vmem>>, vector<16x8xf32>
    %c0_40 = arith.constant 0 : index
    %c0_41 = arith.constant 0 : index
    %62 = vector.load %arg4[%c0_40, %c0_41] : memref<8x256xf32, #tpu.memory_space<vmem>>, vector<8x256xf32>
    %cst_42 = arith.constant dense<0.000000e+00> : vector<16x256xf32>
    %63 = tpu.matmul %61, %62, %cst_42 {dimension_numbers = #tpu.dot_dimension_numbers<[1], [0], [0], [1], [0, 0, 1, 1], [], []>} : vector<16x8xf32>, vector<8x256xf32>, vector<16x256xf32> -> vector<16x256xf32>
    %64 = arith.addf %63, %54 : vector<16x256xf32>
    %cst_43 = arith.constant 0.000000e+00 : f32
    %65 = vector.broadcast %cst_43 : f32 to vector<16x256xf32>
    %66 = arith.maximumf %64, %65 : vector<16x256xf32>
    %67 = arith.index_cast %59 : i32 to index
    %c0_44 = arith.constant 0 : index
    %68 = vector.load %arg8[%67, %c0_44] : memref<128x256xf32, #tpu.memory_space<vmem>>, vector<16x256xf32>
    tpu.vector_store %arg8[%67, %c0_44], %66 {strides = array<i32>} : memref<128x256xf32, #tpu.memory_space<vmem>>, vector<16x256xf32>,
    %c4_i32_45 = arith.constant 4 : i32
    %69 = arith.muli %c4_i32_45, %c0_i32 : i32
    %c2_i32_46 = arith.constant 2 : i32
    %70 = arith.addi %69, %c2_i32_46 : i32
    %c1_i32_47 = arith.constant 1 : i32
    %71 = arith.addi %70, %c1_i32_47 : i32
    %c16_i32_48 = arith.constant 16 : i32
    %72 = arith.muli %71, %c16_i32_48 : i32
    %73 = tpu.assume_multiple %72, 16 : i32
    %74 = arith.index_cast %73 : i32 to index
    %c0_49 = arith.constant 0 : index
    %75 = vector.load %arg1[%74, %c0_49] : memref<128x8xf32, #tpu.memory_space<vmem>>, vector<16x8xf32>
    %c0_50 = arith.constant 0 : index
    %c0_51 = arith.constant 0 : index
    %76 = vector.load %arg4[%c0_50, %c0_51] : memref<8x256xf32, #tpu.memory_space<vmem>>, vector<8x256xf32>
    %cst_52 = arith.constant dense<0.000000e+00> : vector<16x256xf32>
    %77 = tpu.matmul %75, %76, %cst_52 {dimension_numbers = #tpu.dot_dimension_numbers<[1], [0], [0], [1], [0, 0, 1, 1], [], []>} : vector<16x8xf32>, vector<8x256xf32>, vector<16x256xf32> -> vector<16x256xf32>
    %78 = arith.addf %77, %54 : vector<16x256xf32>
    %cst_53 = arith.constant 0.000000e+00 : f32
    %79 = vector.broadcast %cst_53 : f32 to vector<16x256xf32>
    %80 = arith.maximumf %78, %79 : vector<16x256xf32>
    %81 = arith.index_cast %73 : i32 to index
    %c0_54 = arith.constant 0 : index
    %82 = vector.load %arg8[%81, %c0_54] : memref<128x256xf32, #tpu.memory_space<vmem>>, vector<16x256xf32>
    tpu.vector_store %arg8[%81, %c0_54], %80 {strides = array<i32>} : memref<128x256xf32, #tpu.memory_space<vmem>>, vector<16x256xf32>,
    %c1_i32_55 = arith.constant 1 : i32
    %c16_i32_56 = arith.constant 16 : i32
    %83 = arith.muli %c1_i32_55, %c16_i32_56 : i32
    %84 = tpu.assume_multiple %83, 16 : i32
    %85 = arith.index_cast %84 : i32 to index
    %c0_57 = arith.constant 0 : index
    %86 = vector.load %arg3[%85, %c0_57] : memref<32x32xf32, #tpu.memory_space<vmem>>, vector<16x32xf32>
    %c0_58 = arith.constant 0 : index
    %c0_59 = arith.constant 0 : index
    %87 = vector.load %arg6[%c0_58, %c0_59] : memref<32x256xf32, #tpu.memory_space<vmem>>, vector<32x256xf32>
    %cst_60 = arith.constant dense<0.000000e+00> : vector<16x256xf32>
    %88 = tpu.matmul %86, %87, %cst_60 {dimension_numbers = #tpu.dot_dimension_numbers<[1], [0], [0], [1], [0, 0, 1, 1], [], []>} : vector<16x32xf32>, vector<32x256xf32>, vector<16x256xf32> -> vector<16x256xf32>
    %89 = vector.broadcast %0 : vector<1x256xf32> to vector<16x256xf32>
    %90 = arith.addf %88, %89 : vector<16x256xf32>
    %c2_i32_61 = arith.constant 2 : i32
    %91 = arith.muli %c2_i32_61, %c1_i32_55 : i32
    %c0_i32_62 = arith.constant 0 : i32
    %92 = arith.addi %91, %c0_i32_62 : i32
    %c16_i32_63 = arith.constant 16 : i32
    %93 = arith.muli %92, %c16_i32_63 : i32
    %94 = tpu.assume_multiple %93, 16 : i32
    %95 = arith.index_cast %94 : i32 to index
    %c0_64 = arith.constant 0 : index
    %96 = vector.load %arg2[%95, %c0_64] : memref<64x16xf32, #tpu.memory_space<vmem>>, vector<16x16xf32>
    %c0_65 = arith.constant 0 : index
    %c0_66 = arith.constant 0 : index
    %97 = vector.load %arg5[%c0_65, %c0_66] : memref<16x256xf32, #tpu.memory_space<vmem>>, vector<16x256xf32>
    %cst_67 = arith.constant dense<0.000000e+00> : vector<16x256xf32>
    %98 = tpu.matmul %96, %97, %cst_67 {dimension_numbers = #tpu.dot_dimension_numbers<[1], [0], [0], [1], [0, 0, 1, 1], [], []>} : vector<16x16xf32>, vector<16x256xf32>, vector<16x256xf32> -> vector<16x256xf32>
    %99 = arith.addf %98, %90 : vector<16x256xf32>
    %c4_i32_68 = arith.constant 4 : i32
    %100 = arith.muli %c4_i32_68, %c1_i32_55 : i32
    %c0_i32_69 = arith.constant 0 : i32
    %101 = arith.addi %100, %c0_i32_69 : i32
    %c0_i32_70 = arith.constant 0 : i32
    %102 = arith.addi %101, %c0_i32_70 : i32
    %c16_i32_71 = arith.constant 16 : i32
    %103 = arith.muli %102, %c16_i32_71 : i32
    %104 = tpu.assume_multiple %103, 16 : i32
    %105 = arith.index_cast %104 : i32 to index
    %c0_72 = arith.constant 0 : index
    %106 = vector.load %arg1[%105, %c0_72] : memref<128x8xf32, #tpu.memory_space<vmem>>, vector<16x8xf32>
    %c0_73 = arith.constant 0 : index
    %c0_74 = arith.constant 0 : index
    %107 = vector.load %arg4[%c0_73, %c0_74] : memref<8x256xf32, #tpu.memory_space<vmem>>, vector<8x256xf32>
    %cst_75 = arith.constant dense<0.000000e+00> : vector<16x256xf32>
    %108 = tpu.matmul %106, %107, %cst_75 {dimension_numbers = #tpu.dot_dimension_numbers<[1], [0], [0], [1], [0, 0, 1, 1], [], []>} : vector<16x8xf32>, vector<8x256xf32>, vector<16x256xf32> -> vector<16x256xf32>
    %109 = arith.addf %108, %99 : vector<16x256xf32>
    %cst_76 = arith.constant 0.000000e+00 : f32
    %110 = vector.broadcast %cst_76 : f32 to vector<16x256xf32>
    %111 = arith.maximumf %109, %110 : vector<16x256xf32>
    %112 = arith.index_cast %104 : i32 to index
    %c0_77 = arith.constant 0 : index
    %113 = vector.load %arg8[%112, %c0_77] : memref<128x256xf32, #tpu.memory_space<vmem>>, vector<16x256xf32>
    tpu.vector_store %arg8[%112, %c0_77], %111 {strides = array<i32>} : memref<128x256xf32, #tpu.memory_space<vmem>>, vector<16x256xf32>,
    %c4_i32_78 = arith.constant 4 : i32
    %114 = arith.muli %c4_i32_78, %c1_i32_55 : i32
    %c0_i32_79 = arith.constant 0 : i32
    %115 = arith.addi %114, %c0_i32_79 : i32
    %c1_i32_80 = arith.constant 1 : i32
    %116 = arith.addi %115, %c1_i32_80 : i32
    %c16_i32_81 = arith.constant 16 : i32
    %117 = arith.muli %116, %c16_i32_81 : i32
    %118 = tpu.assume_multiple %117, 16 : i32
    %119 = arith.index_cast %118 : i32 to index
    %c0_82 = arith.constant 0 : index
    %120 = vector.load %arg1[%119, %c0_82] : memref<128x8xf32, #tpu.memory_space<vmem>>, vector<16x8xf32>
    %c0_83 = arith.constant 0 : index
    %c0_84 = arith.constant 0 : index
    %121 = vector.load %arg4[%c0_83, %c0_84] : memref<8x256xf32, #tpu.memory_space<vmem>>, vector<8x256xf32>
    %cst_85 = arith.constant dense<0.000000e+00> : vector<16x256xf32>
    %122 = tpu.matmul %120, %121, %cst_85 {dimension_numbers = #tpu.dot_dimension_numbers<[1], [0], [0], [1], [0, 0, 1, 1], [], []>} : vector<16x8xf32>, vector<8x256xf32>, vector<16x256xf32> -> vector<16x256xf32>
    %123 = arith.addf %122, %99 : vector<16x256xf32>
    %cst_86 = arith.constant 0.000000e+00 : f32
    %124 = vector.broadcast %cst_86 : f32 to vector<16x256xf32>
    %125 = arith.maximumf %123, %124 : vector<16x256xf32>
    %126 = arith.index_cast %118 : i32 to index
    %c0_87 = arith.constant 0 : index
    %127 = vector.load %arg8[%126, %c0_87] : memref<128x256xf32, #tpu.memory_space<vmem>>, vector<16x256xf32>
    tpu.vector_store %arg8[%126, %c0_87], %125 {strides = array<i32>} : memref<128x256xf32, #tpu.memory_space<vmem>>, vector<16x256xf32>,
    %c2_i32_88 = arith.constant 2 : i32
    %128 = arith.muli %c2_i32_88, %c1_i32_55 : i32
    %c1_i32_89 = arith.constant 1 : i32
    %129 = arith.addi %128, %c1_i32_89 : i32
    %c16_i32_90 = arith.constant 16 : i32
    %130 = arith.muli %129, %c16_i32_90 : i32
    %131 = tpu.assume_multiple %130, 16 : i32
    %132 = arith.index_cast %131 : i32 to index
    %c0_91 = arith.constant 0 : index
    %133 = vector.load %arg2[%132, %c0_91] : memref<64x16xf32, #tpu.memory_space<vmem>>, vector<16x16xf32>
    %c0_92 = arith.constant 0 : index
    %c0_93 = arith.constant 0 : index
    %134 = vector.load %arg5[%c0_92, %c0_93] : memref<16x256xf32, #tpu.memory_space<vmem>>, vector<16x256xf32>
    %cst_94 = arith.constant dense<0.000000e+00> : vector<16x256xf32>
    %135 = tpu.matmul %133, %134, %cst_94 {dimension_numbers = #tpu.dot_dimension_numbers<[1], [0], [0], [1], [0, 0, 1, 1], [], []>} : vector<16x16xf32>, vector<16x256xf32>, vector<16x256xf32> -> vector<16x256xf32>
    %136 = arith.addf %135, %90 : vector<16x256xf32>
    %c4_i32_95 = arith.constant 4 : i32
    %137 = arith.muli %c4_i32_95, %c1_i32_55 : i32
    %c2_i32_96 = arith.constant 2 : i32
    %138 = arith.addi %137, %c2_i32_96 : i32
    %c0_i32_97 = arith.constant 0 : i32
    %139 = arith.addi %138, %c0_i32_97 : i32
    %c16_i32_98 = arith.constant 16 : i32
    %140 = arith.muli %139, %c16_i32_98 : i32
    %141 = tpu.assume_multiple %140, 16 : i32
    %142 = arith.index_cast %141 : i32 to index
    %c0_99 = arith.constant 0 : index
    %143 = vector.load %arg1[%142, %c0_99] : memref<128x8xf32, #tpu.memory_space<vmem>>, vector<16x8xf32>
    %c0_100 = arith.constant 0 : index
    %c0_101 = arith.constant 0 : index
    %144 = vector.load %arg4[%c0_100, %c0_101] : memref<8x256xf32, #tpu.memory_space<vmem>>, vector<8x256xf32>
    %cst_102 = arith.constant dense<0.000000e+00> : vector<16x256xf32>
    %145 = tpu.matmul %143, %144, %cst_102 {dimension_numbers = #tpu.dot_dimension_numbers<[1], [0], [0], [1], [0, 0, 1, 1], [], []>} : vector<16x8xf32>, vector<8x256xf32>, vector<16x256xf32> -> vector<16x256xf32>
    %146 = arith.addf %145, %136 : vector<16x256xf32>
    %cst_103 = arith.constant 0.000000e+00 : f32
    %147 = vector.broadcast %cst_103 : f32 to vector<16x256xf32>
    %148 = arith.maximumf %146, %147 : vector<16x256xf32>
    %149 = arith.index_cast %141 : i32 to index
    %c0_104 = arith.constant 0 : index
    %150 = vector.load %arg8[%149, %c0_104] : memref<128x256xf32, #tpu.memory_space<vmem>>, vector<16x256xf32>
    tpu.vector_store %arg8[%149, %c0_104], %148 {strides = array<i32>} : memref<128x256xf32, #tpu.memory_space<vmem>>, vector<16x256xf32>,
    %c4_i32_105 = arith.constant 4 : i32
    %151 = arith.muli %c4_i32_105, %c1_i32_55 : i32
    %c2_i32_106 = arith.constant 2 : i32
    %152 = arith.addi %151, %c2_i32_106 : i32
    %c1_i32_107 = arith.constant 1 : i32
    %153 = arith.addi %152, %c1_i32_107 : i32
    %c16_i32_108 = arith.constant 16 : i32
    %154 = arith.muli %153, %c16_i32_108 : i32
    %155 = tpu.assume_multiple %154, 16 : i32
    %156 = arith.index_cast %155 : i32 to index
    %c0_109 = arith.constant 0 : index
    %157 = vector.load %arg1[%156, %c0_109] : memref<128x8xf32, #tpu.memory_space<vmem>>, vector<16x8xf32>
    %c0_110 = arith.constant 0 : index
    %c0_111 = arith.constant 0 : index
    %158 = vector.load %arg4[%c0_110, %c0_111] : memref<8x256xf32, #tpu.memory_space<vmem>>, vector<8x256xf32>
    %cst_112 = arith.constant dense<0.000000e+00> : vector<16x256xf32>
    %159 = tpu.matmul %157, %158, %cst_112 {dimension_numbers = #tpu.dot_dimension_numbers<[1], [0], [0], [1], [0, 0, 1, 1], [], []>} : vector<16x8xf32>, vector<8x256xf32>, vector<16x256xf32> -> vector<16x256xf32>
    %160 = arith.addf %159, %136 : vector<16x256xf32>
    %cst_113 = arith.constant 0.000000e+00 : f32
    %161 = vector.broadcast %cst_113 : f32 to vector<16x256xf32>
    %162 = arith.maximumf %160, %161 : vector<16x256xf32>
    %163 = arith.index_cast %155 : i32 to index
    %c0_114 = arith.constant 0 : index
    %164 = vector.load %arg8[%163, %c0_114] : memref<128x256xf32, #tpu.memory_space<vmem>>, vector<16x256xf32>
    tpu.vector_store %arg8[%163, %c0_114], %162 {strides = array<i32>} : memref<128x256xf32, #tpu.memory_space<vmem>>, vector<16x256xf32>,
    %c2_i32_115 = arith.constant 2 : i32
    return
  }
  func.func @transform_0(%arg0: i32) -> (i32, i32) {
    %c0_i32 = arith.constant 0 : i32
    %c0_i32_0 = arith.constant 0 : i32
    return %arg0, %c0_i32 : i32, i32
  }
  func.func @transform_1(%arg0: i32) -> (i32, i32) {
    %c0_i32 = arith.constant 0 : i32
    %c0_i32_0 = arith.constant 0 : i32
    return %arg0, %c0_i32 : i32, i32
  }
  func.func @transform_2(%arg0: i32) -> (i32, i32) {
    %c0_i32 = arith.constant 0 : i32
    %c0_i32_0 = arith.constant 0 : i32
    return %arg0, %c0_i32 : i32, i32
  }
  func.func @transform_3(%arg0: i32) -> (i32, i32) {
    %c0_i32 = arith.constant 0 : i32
    %c0_i32_0 = arith.constant 0 : i32
    %c0_i32_1 = arith.constant 0 : i32
    return %c0_i32, %c0_i32_0 : i32, i32
  }
  func.func @transform_4(%arg0: i32) -> (i32, i32) {
    %c0_i32 = arith.constant 0 : i32
    %c0_i32_0 = arith.constant 0 : i32
    %c0_i32_1 = arith.constant 0 : i32
    return %c0_i32, %c0_i32_0 : i32, i32
  }
  func.func @transform_5(%arg0: i32) -> (i32, i32) {
    %c0_i32 = arith.constant 0 : i32
    %c0_i32_0 = arith.constant 0 : i32
    %c0_i32_1 = arith.constant 0 : i32
    return %c0_i32, %c0_i32_0 : i32, i32
  }
  func.func @transform_6(%arg0: i32) -> (i32, i32) {
    %c0_i32 = arith.constant 0 : i32
    %c0_i32_0 = arith.constant 0 : i32
    %c0_i32_1 = arith.constant 0 : i32
    return %c0_i32, %c0_i32_0 : i32, i32
  }
  func.func @transform_7(%arg0: i32) -> (i32, i32) {
    %c0_i32 = arith.constant 0 : i32
    %c0_i32_0 = arith.constant 0 : i32
    return %arg0, %c0_i32 : i32, i32
  }
}

</mosaic_0001>

<bundles_post_ra>
// kernel: tpu_custom_call.1
= control target key start
LH: loop header
LB: loop body
LE: loop exit
PB: predicated region body
PF: predicated region fallthrough
CT: control target
= control target key end

     0   :  { %12 = vsyncpa [#allocation3], 0  ;;  %s1982_s0 = inlined_call_operand.vmem [shape: f32[512,8], index: 0, kind: input, shape index: {}]   ;;  %s1983_s1 = inlined_call_operand.vmem [shape: f32[256,16], index: 1, kind: input, shape index: {}]   ;;  %s1984_s2 = inlined_call_operand.vmem [shape: f32[128,32], index: 2, kind: input, shape index: {}]   ;;  %s1985_s3 = inlined_call_operand.vmem [shape: f32[8,256], index: 3, kind: input, shape index: {}]   ;;  %s1986_s4 = inlined_call_operand.vmem [shape: f32[16,256], index: 4, kind: input, shape index: {}]   ;;  %s1987_s5 = inlined_call_operand.vmem [shape: f32[32,256], index: 5, kind: input, shape index: {}]   ;;  %s1988_s6 = inlined_call_operand.vmem [shape: f32[1,256], index: 6, kind: input, shape index: {}]   ;;  %s1989_s7 = inlined_call_operand.hbm [shape: f32[512,256], index: 7, kind: output, shape index: {}]  }
   0x1   :  { %14 = vsyncpa [#allocation3 + $0x1], 0  ;;  %s1618_s24 = smov 0   ;;  %s1620_s25 = smov 0  }
   0x2   :  { %s1622_s26 = smov 0   ;;  %s1624_s27 = smov 0  }
   0x3 LB: > { %s1639_s28 = sadd.s32 4294967295, %s1574_s27   ;;  %s1346_s29 = sadd.s32 4294967294, %s1574_s27   ;;  %s1574_s27 = sphi %s1624_s27, %s1996_s27   ;;  %s1570_s26 = sphi %s1622_s26, %s1995_s26   ;;  %s1566_s25 = sphi %s1620_s25, %s1994_s25   ;;  %s1562_s24 = sphi %s1618_s24, %s1993_s24  }
   0x4   : > { %s1643_s30 = sadd.s32 1, %s1574_s27   ;;  %s189_s8 = sadd.s32 1, %s1570_s26 }
   0x5   : > { %s186_s9 = ssub.s32 %s1574_s27, %s1643_s30  ;;  %p199_p0 = scmp.ne.s32.totalorder %s1570_s26, %s1566_s25 }
   0x6   : > { %p187_p1 = scmp.eq.s32.totalorder %s186_s9, 0  ;;  %p200_p2 = scmp.eq.s32.totalorder %s1639_s28, 3 }
   0x7   : > { %p205_p3 = scmp.ne.s32.totalorder %s1566_s25, %s1562_s24  ;;  %p206_p4 = scmp.eq.s32.totalorder %s1346_s29, 3 }
   0x8   : > { %s1654_s10 = scalar_select %p187_p1, %s1570_s26, %s189_s8  }
   0x9   : > { %p1656_p5 = por %p200_p2, %p199_p0  ;;  %p1660_p6 = por %p206_p4, %p205_p3 }
   0xa   : > { %p1349_p7 = scmp.ge.s32.totalorder %s1574_s27, 1  ;;  %p263_p8 = scmp.lt.s32.totalorder %s1574_s27, 5 }
   0xc   : > { %p264_p9 = pnand %p1349_p7, %p263_p8 }
   0xd   : > { %s1355_s19 = sshll.u32 (!%p264_p9), %s1639_s28, 2  ;;  %s1353_s20 = sshll.u32 (!%p264_p9), %s1639_s28, 3 }
   0xe   : > { %267 = sbr.rel (%p264_p9) target bundleno = 273 (0x111), region = 48  ;;  %p318_p10 = scmp.lt.s32.totalorder (!%p264_p9), %s1355_s19, 15 }
   0xf   : > { %p1695_p11 = scmp.lt.s32.totalorder (!%p264_p9), %s1353_s20, 31  ;;  %s1351_s18 = sshll.u32 (!%p264_p9), %s1639_s28, 4 }
  0x10   : > { %p306_p12 = scmp.lt.s32.totalorder (!%p264_p9), %s1351_s18, 63 }
  0x13   : > { %v1669_v0 = vld [vmem:[%s1987_s5 + $0x30] sm:$0xff]  ;;  %v1674_v1 = vld [vmem:[%s1987_s5 + $0x38] sm:$0xff]  ;;  %v1679_v2 = vld [vmem:[%s1987_s5 + $0x20] sm:$0xff]  ;;  %s1998_s19 = smov (!%p318_p10, %s1355_s19), 15  ;;  %s2000_s20 = smov (!%p1695_p11, %s1353_s20), 31  ;;  %vm340_vm0 = vcmask 261120  }
  0x14   : > { %359 = vmatpush.msra.mxu0 %v1669_v0  ;;  %382 = vmatpush.msra.mxu1 %v1674_v1  ;;  %v1688_v3 = vld [vmem:[%s1987_s5 + $0x28] sm:$0xff]  ;;  %v1693_v4 = vld [vmem:[%s1987_s5 + $0x10] sm:$0xff]  ;;  %v1702_v5 = vld [vmem:[%s1987_s5 + $0x18] sm:$0xff]  ;;  %s1356_s16 = sshll.u32 %s1998_s19, 3  ;;  %s1354_s23 = sshll.u32 %s2000_s20, 3  ;;  %vm399_vm1 = vcmask 130048  }
  0x15   : > { %v1707_v6 = vld [vmem:[%s1986_s4 + $0x10] sm:$0xff]  ;;  %v1712_v7 = vld [vmem:[%s1986_s4 + $0x18] sm:$0xff]  ;;  %v1720_v8 = vld [vmem:[%s1986_s4] sm:$0xff]  ;;  %s1748_s22 = scalar_lea.vmem %s1984_s2, %s1356_s16  ;;  %s1756_s29 = scalar_lea.vmem %s1983_s1, %s1354_s23  ;;  %vm456_vm2 = vcmask 64512  }
  0x16   : > { %360 = vmatpush.msra.mxu0 %v1679_v2  ;;  %383 = vmatpush.msra.mxu1 %v1688_v3  ;;  %v1725_v9 = vld [vmem:[%s1986_s4 + $0x8] sm:$0xff]  ;;  %v1732_v10 = vld [vmem:[%s1987_s5] sm:$0xff]  ;;  %s2002_s18 = smov (!%p306_p12, %s1351_s18), 63  ;;  %v1379_v23 = vld [vmem:[%s1756_s29 + $0x10] sm:$0xff]  ;;  %s302_s23 = sand.u32 1, %s1566_s25  }
  0x17   : > { %420 = vmatpush.msra.mxu2 %v1707_v6  ;;  %443 = vmatpush.msra.mxu3 %v1712_v7  ;;  %v1737_v11 = vld [vmem:[%s1987_s5 + $0x8] sm:$0xff]  ;;  %v325_v12 = vld [vmem:[%s1748_s22] sm:$0xff]  ;;  %s1352_s15 = sshll.u32 %s2002_s18, 3  ;;  %v1380_v25 = vld [vmem:[%s1756_s29 + $0x18] sm:$0xff]  ;;  %s1350_s19 = sshll.u32 %s302_s23, 8 }
  0x18   : > { %361 = vmatpush.msra.mxu0 %v1693_v4  ;;  %384 = vmatpush.msra.mxu1 %v1702_v5  ;;  %v1761_v13 = vld [vmem:[%s1985_s3] sm:$0xff]  ;;  %v1766_v14 = vld [vmem:[%s1985_s3 + $0x8] sm:$0xff]  ;;  %s1796_s21 = scalar_lea.vmem %s1982_s0, %s1352_s15  ;;  %v1405_v26 = vld [vmem:[%s1748_s22 + $0x10] sm:$0xff]  ;;  %s1910_s8 = scalar_lea.vmem [#allocation2], %s1350_s19 }
  0x19   : > { %421 = vmatpush.msra.mxu2 %v1720_v8  ;;  %444 = vmatpush.msra.mxu3 %v1725_v9  ;;  %v393_v15 = vld [vmem:[%s1756_s29] sm:$0xff]  ;;  %v326_v16 = vld [vmem:[%s1748_s22 + $0x8] sm:$0xff]  ;;  %v1369_v18 = vld [vmem:[%s1796_s21 + $0x10] sm:$0xff]  ;;  %s1250_s14 = sshll.u32 %s1910_s8, 4  ;;  %s1237_s15 = scalar_lea.sflag [#allocation3], %s302_s23  ;;  %s1251_s14 = int_to_ptr.vmem [resolvable:$true] %s1250_s14 }
  0x1a   : > { %362 = vmatpush.msra.mxu0 %v1732_v10  ;;  %385 = vmatpush.msra.mxu1 %v1737_v11  ;;  %v394_v17 = vld [vmem:[%s1756_s29 + $0x8] sm:$0xff]  ;;  %v452_v19 = vld [vmem:[%s1796_s21] sm:$0xff]  ;;  %v1370_v20 = vld [vmem:[%s1796_s21 + $0x18] sm:$0xff] }
  0x1b   : > { %1357 = vmatmul.msk.f32.vlgmr.msra.gmra.mxu0 %vm340_vm0, %v325_v12  ;;  %1359 = vmatmul.msk.f32.vlgmr.msra.gmra.mxu1 %vm340_vm0, %v325_v12  ;;  %v453_v21 = vld [vmem:[%s1796_s21 + $0x8] sm:$0xff]  ;;  %v1385_v22 = vld [vmem:[%s1796_s21 + $0x20] sm:$0xff]  ;;  %v1395_v27 = vld [vmem:[%s1796_s21 + $0x30] sm:$0xff] }
  0x1c   : > { %1361 = vmatmul.msk.f32.vlgmr.msra.gmra.mxu2 %vm399_vm1, %v393_v15  ;;  %1363 = vmatmul.msk.f32.vlgmr.msra.gmra.mxu3 %vm399_vm1, %v393_v15  ;;  %v1386_v24 = vld [vmem:[%s1796_s21 + $0x28] sm:$0xff]  ;;  %v1406_v28 = vld [vmem:[%s1748_s22 + $0x18] sm:$0xff]  ;;  %v1417_v30 = vld [vmem:[%s1796_s21 + $0x40] sm:$0xff]  ;;  %s1532_s22 = scalar_lea.hbm %s1989_s7, 1024 }
  0x1d   : > { %478 = vmatpush.msrb.mxu2 %v1761_v13  ;;  %501 = vmatpush.msrb.mxu3 %v1766_v14  ;;  %v1396_v29 = vld [vmem:[%s1796_s21 + $0x38] sm:$0xff]  ;;  %v1411_v31 = vld [vmem:[%s1756_s29 + $0x20] sm:$0xff]  ;;  %v1418_v32 = vld [vmem:[%s1796_s21 + $0x48] sm:$0xff] }
  0x1e   : > { %546 = vmatpush.msrb.mxu0 %v1761_v13  ;;  %569 = vmatpush.msrb.mxu1 %v1766_v14  ;;  %v1412_v33 = vld [vmem:[%s1756_s29 + $0x28] sm:$0xff]  ;;  %v1437_v34 = vld [vmem:[%s1756_s29 + $0x30] sm:$0xff]  ;;  %v1438_v36 = vld [vmem:[%s1756_s29 + $0x38] sm:$0xff]  ;;  %s1470_s29 = sshll.u32 %s1639_s28, 8 }
  0x1f   : > { %615 = vmatpush.msra.mxu2 %v1707_v6  ;;  %638 = vmatpush.msra.mxu3 %v1712_v7  ;;  %v1427_v35 = vld [vmem:[%s1796_s21 + $0x50] sm:$0xff]  ;;  %v1428_v37 = vld [vmem:[%s1796_s21 + $0x58] sm:$0xff]  ;;  %v1443_v39 = vld [vmem:[%s1796_s21 + $0x60] sm:$0xff]  ;;  %s1249_s20 = scalar_lea.hbm %s1989_s7, %s1470_s29 }
  0x20   : > { %673 = vmatpush.msra.mxu0 %v1761_v13  ;;  %696 = vmatpush.msra.mxu1 %v1766_v14  ;;  %v1453_v38 = vld [vmem:[%s1796_s21 + $0x70] sm:$0xff]  ;;  %v1454_v40 = vld [vmem:[%s1796_s21 + $0x78] sm:$0xff]  ;;  %v1444_v41 = vld [vmem:[%s1796_s21 + $0x68] sm:$0xff]  ;;  %s1252_s28 = sshll.u32 %s1249_s20, 4  ;;  %s1253_s28 = int_to_ptr.hbm [resolvable:$true] %s1252_s28 }
  0x21   : > { %616 = vmatpush.msra.mxu2 %v1720_v8  ;;  %639 = vmatpush.msra.mxu3 %v1725_v9  ;;  %v324_v44 = vld [vmem:[%s1988_s6] sm:$0x3]  ;;  %s1526_s16 = sshra.s32 %s1253_s28, 4  ;;  %s1527_s16 = int_to_ptr.hbm [resolvable:$true] %s1526_s16 }
  0x22   : > { %v1899_v45 = vperm.slane %v324_v44, 0  ;;  %v1901_v46 = vperm.slane %v324_v44, 1  ;;  %s1528_s17 = scalar_lea.hbm %s1527_s16, 256  ;;  %p1533_p2 = scmp.lt.s32.totalorder %s1527_s16, %s1989_s7 }
  0x23   : > { %1358 = vmatmul.msk.f32.gmra.mxu0 %vm340_vm0, %v326_v16  ;;  %1360 = vmatmul.msk.f32.gmra.mxu1 %vm340_vm0, %v326_v16  ;;  %p1529_p13 = scmp.ne.s32.totalorder %s1527_s16, %s1528_s17  ;;  %p1534_p3 = scmp.lt.s32.totalorder %s1532_s22, %s1528_s17 }
  0x24   : > { %1362 = vmatmul.msk.f32.gmra.mxu2 %vm399_vm1, %v394_v17  ;;  %1364 = vmatmul.msk.f32.gmra.mxu3 %vm399_vm1, %v394_v17 }
  0x25   : > { %p1530_p0 = pnand %p1529_p13, %p1656_p5  ;;  %p1535_p4 = por %p1534_p3, %p1533_p2 }
  0x27   : > { %p1531_p1 = pneg %p1530_p0 }
  0x29   : > { %p1536_p7 = pnand %p1535_p4, %p1531_p1 }
  0x2b   : > { %1371 = vmatmul.msk.f32.vlgmr.msrb.gmra.mxu0 %vm456_vm2, %v1369_v18  ;;  %1373 = vmatmul.msk.f32.vlgmr.msrb.gmra.mxu1 %vm456_vm2, %v1369_v18 }
  0x2c   : > { %1365 = vmatmul.msk.f32.vlgmr.msrb.gmra.mxu2 %vm456_vm2, %v452_v19  ;;  %1367 = vmatmul.msk.f32.vlgmr.msrb.gmra.mxu3 %vm456_vm2, %v452_v19 }
  0x2d   : > { %741 = vmatpush.msrb.mxu2 %v1761_v13  ;;  %764 = vmatpush.msrb.mxu3 %v1766_v14 }
  0x2e   : > { %812 = vmatpush.msrb.mxu0 %v1669_v0  ;;  %835 = vmatpush.msrb.mxu1 %v1674_v1 }
  0x30   : > { %813 = vmatpush.msrb.mxu0 %v1679_v2  ;;  %836 = vmatpush.msrb.mxu1 %v1688_v3 }
  0x32   : > { %814 = vmatpush.msrb.mxu0 %v1693_v4  ;;  %837 = vmatpush.msrb.mxu1 %v1702_v5 }
  0x33   : > { %1372 = vmatmul.msk.f32.gmra.mxu0 %vm456_vm2, %v1370_v20  ;;  %1374 = vmatmul.msk.f32.gmra.mxu1 %vm456_vm2, %v1370_v20 }
  0x34   : > { %1366 = vmatmul.msk.f32.gmra.mxu2 %vm456_vm2, %v453_v21  ;;  %1368 = vmatmul.msk.f32.gmra.mxu3 %vm456_vm2, %v453_v21 }
  0x35   : > { %815 = vmatpush.msrb.mxu0 %v1732_v10  ;;  %838 = vmatpush.msrb.mxu1 %v1737_v11 }
  0x3b   : > { %1387 = vmatmul.msk.f32.vlgmr.msra.gmra.mxu0 %vm456_vm2, %v1385_v22  ;;  %1389 = vmatmul.msk.f32.vlgmr.msra.gmra.mxu1 %vm456_vm2, %v1385_v22 }
  0x3c   : > { %1381 = vmatmul.msk.f32.vlgmr.msra.gmra.mxu2 %vm399_vm1, %v1379_v23  ;;  %1383 = vmatmul.msk.f32.vlgmr.msra.gmra.mxu3 %vm399_vm1, %v1379_v23 }
  0x3d   : > { %873 = vmatpush.msra.mxu2 %v1707_v6  ;;  %896 = vmatpush.msra.mxu3 %v1712_v7 }
  0x3e   : > { %931 = vmatpush.msra.mxu0 %v1761_v13  ;;  %954 = vmatpush.msra.mxu1 %v1766_v14 }
  0x3f   : > { %874 = vmatpush.msra.mxu2 %v1720_v8  ;;  %897 = vmatpush.msra.mxu3 %v1725_v9 }
  0x43   : > { %1388 = vmatmul.msk.f32.gmra.mxu0 %vm456_vm2, %v1386_v24  ;;  %1390 = vmatmul.msk.f32.gmra.mxu1 %vm456_vm2, %v1386_v24 }
  0x44   : > { %1382 = vmatmul.msk.f32.gmra.mxu2 %vm399_vm1, %v1380_v25  ;;  %1384 = vmatmul.msk.f32.gmra.mxu3 %vm399_vm1, %v1380_v25 }
  0x4b   : > { %1407 = vmatmul.msk.f32.vlgmr.msrb.gmra.mxu0 %vm340_vm0, %v1405_v26  ;;  %1409 = vmatmul.msk.f32.vlgmr.msrb.gmra.mxu1 %vm340_vm0, %v1405_v26 }
  0x4c   : > { %1397 = vmatmul.msk.f32.vlgmr.msrb.gmra.mxu2 %vm456_vm2, %v1395_v27  ;;  %1399 = vmatmul.msk.f32.vlgmr.msrb.gmra.mxu3 %vm456_vm2, %v1395_v27 }
  0x4d   : > { %999 = vmatpush.msrb.mxu2 %v1761_v13  ;;  %1022 = vmatpush.msrb.mxu3 %v1766_v14 }
  0x4e   : > { %1068 = vmatpush.msrb.mxu0 %v1707_v6  ;;  %1091 = vmatpush.msrb.mxu1 %v1712_v7 }
  0x50   : > { %1069 = vmatpush.msrb.mxu0 %v1720_v8  ;;  %1092 = vmatpush.msrb.mxu1 %v1725_v9 }
  0x53   : > { %1408 = vmatmul.msk.f32.gmra.mxu0 %vm340_vm0, %v1406_v28  ;;  %1410 = vmatmul.msk.f32.gmra.mxu1 %vm340_vm0, %v1406_v28 }
  0x54   : > { %1398 = vmatmul.msk.f32.gmra.mxu2 %vm456_vm2, %v1396_v29  ;;  %1400 = vmatmul.msk.f32.gmra.mxu3 %vm456_vm2, %v1396_v29 }
  0x5b   : > { %1419 = vmatmul.msk.f32.vlgmr.msra.gmra.mxu0 %vm456_vm2, %v1417_v30  ;;  %1421 = vmatmul.msk.f32.vlgmr.msra.gmra.mxu1 %vm456_vm2, %v1417_v30 }
  0x5c   : > { %1413 = vmatmul.msk.f32.vlgmr.msra.gmra.mxu2 %vm399_vm1, %v1411_v31  ;;  %1415 = vmatmul.msk.f32.vlgmr.msra.gmra.mxu3 %vm399_vm1, %v1411_v31 }
  0x5d   : > { %1126 = vmatpush.msra.mxu2 %v1761_v13  ;;  %1149 = vmatpush.msra.mxu3 %v1766_v14 }
  0x5e   : > { %1194 = vmatpush.msra.mxu0 %v1761_v13  ;;  %1217 = vmatpush.msra.mxu1 %v1766_v14 }
  0x63   : > { %1420 = vmatmul.msk.f32.gmra.mxu0 %vm456_vm2, %v1418_v32  ;;  %1422 = vmatmul.msk.f32.gmra.mxu1 %vm456_vm2, %v1418_v32 }
  0x64   : > { %1414 = vmatmul.msk.f32.gmra.mxu2 %vm399_vm1, %v1412_v33  ;;  %1416 = vmatmul.msk.f32.gmra.mxu3 %vm399_vm1, %v1412_v33 }
  0x6b   : > { %1439 = vmatmul.msk.f32.vlgmr.msrb.gmra.mxu0 %vm399_vm1, %v1437_v34  ;;  %1441 = vmatmul.msk.f32.vlgmr.msrb.gmra.mxu1 %vm399_vm1, %v1437_v34 }
  0x6c   : > { %1429 = vmatmul.msk.f32.vlgmr.msrb.gmra.mxu2 %vm456_vm2, %v1427_v35  ;;  %1431 = vmatmul.msk.f32.vlgmr.msrb.gmra.mxu3 %vm456_vm2, %v1427_v35 }
  0x73   : > { %1440 = vmatmul.msk.f32.gmra.mxu0 %vm399_vm1, %v1438_v36  ;;  %1442 = vmatmul.msk.f32.gmra.mxu1 %vm399_vm1, %v1438_v36 }
  0x74   : > { %1430 = vmatmul.msk.f32.gmra.mxu2 %vm456_vm2, %v1428_v37  ;;  %1432 = vmatmul.msk.f32.gmra.mxu3 %vm456_vm2, %v1428_v37 }
  0x7b   : > { %1455 = vmatmul.msk.f32.vlgmr.msra.gmra.mxu0 %vm456_vm2, %v1453_v38  ;;  %1457 = vmatmul.msk.f32.vlgmr.msra.gmra.mxu1 %vm456_vm2, %v1453_v38 }
  0x7c   : > { %1445 = vmatmul.msk.f32.vlgmr.msra.gmra.mxu2 %vm456_vm2, %v1443_v39  ;;  %1447 = vmatmul.msk.f32.vlgmr.msra.gmra.mxu3 %vm456_vm2, %v1443_v39 }
  0x83   : > { %1456 = vmatmul.msk.f32.gmra.mxu0 %vm456_vm2, %v1454_v40  ;;  %1458 = vmatmul.msk.f32.gmra.mxu1 %vm456_vm2, %v1454_v40 }
  0x84   : > { %1446 = vmatmul.msk.f32.gmra.mxu2 %vm456_vm2, %v1444_v41  ;;  %1448 = vmatmul.msk.f32.gmra.mxu3 %vm456_vm2, %v1444_v41 }
  0x98   : > { %v364_v42 = vpop.f32.mrf.mxu0  ;;  %v387_v43 = vpop.f32.mrf.mxu1 }
  0x99   : > { %v365_v51 = vadd.f32 %v364_v42, %v1899_v45  ;;  %v388_v52 = vadd.f32 %v387_v43, %v1901_v46 }
  0x9f   : > { %v423_v47 = vpop.f32.mrf.mxu2  ;;  %v446_v48 = vpop.f32.mrf.mxu3 }
  0xa0   : > { %v367_v49 = vpop.f32.mrf.mxu0  ;;  %v390_v50 = vpop.f32.mrf.mxu1  ;;  %v424_v53 = vadd.f32 %v423_v47, %v365_v51  ;;  %v447_v54 = vadd.f32 %v446_v48, %v388_v52 }
  0xa1   : > { %v368_v61 = vadd.f32 %v367_v49, %v1899_v45  ;;  %v391_v62 = vadd.f32 %v390_v50, %v1901_v46 }
  0xa7   : > { %v426_v55 = vpop.f32.mrf.mxu2  ;;  %v449_v56 = vpop.f32.mrf.mxu3 }
  0xa8   : > { %v548_v57 = vpop.f32.mrf.mxu0  ;;  %v571_v58 = vpop.f32.mrf.mxu1  ;;  %v427_v1 = vadd.f32 %v426_v55, %v368_v61  ;;  %v450_v2 = vadd.f32 %v449_v56, %v391_v62 }
  0xa9   : > { %v549_v59 = vadd.f32 %v548_v57, %v424_v53  ;;  %v572_v60 = vadd.f32 %v571_v58, %v447_v54 }
  0xab   : > { %v577_v63 = vmax.f32 %v549_v59, 0.0  ;;  %v578_v0 = vmax.f32 %v572_v60, 0.0 }
  0xad   : > { %1375 = vst [vmem:[%s1910_s8 + $0x20] sm:$0xff] %v577_v63 }
  0xae   : > { %1376 = vst [vmem:[%s1910_s8 + $0x28] sm:$0xff] %v578_v0 }
  0xaf   : > { %v480_v3 = vpop.f32.mrf.mxu2  ;;  %v503_v4 = vpop.f32.mrf.mxu3 }
  0xb0   : > { %v481_v5 = vadd.f32 %v480_v3, %v424_v53  ;;  %v504_v6 = vadd.f32 %v503_v4, %v447_v54  ;;  %v551_v7 = vpop.f32.mrf.mxu0  ;;  %v574_v8 = vpop.f32.mrf.mxu1 }
  0xb1   : > { %v552_v9 = vadd.f32 %v551_v7, %v427_v1  ;;  %v575_v10 = vadd.f32 %v574_v8, %v450_v2 }
  0xb2   : > { %v509_v11 = vmax.f32 %v481_v5, 0.0  ;;  %v510_v12 = vmax.f32 %v504_v6, 0.0 }
  0xb3   : > { %v579_v13 = vmax.f32 %v552_v9, 0.0  ;;  %v580_v14 = vmax.f32 %v575_v10, 0.0 }
  0xb4   : > { %516 = vst [vmem:[%s1910_s8] sm:$0xff] %v509_v11 }
  0xb5   : > { %517 = vst [vmem:[%s1910_s8 + $0x8] sm:$0xff] %v510_v12 }
  0xb6   : > { %1377 = vst [vmem:[%s1910_s8 + $0x30] sm:$0xff] %v579_v13 }
  0xb7   : > { %1378 = vst [vmem:[%s1910_s8 + $0x38] sm:$0xff] %v580_v14  ;;  %v483_v15 = vpop.f32.mrf.mxu2  ;;  %v506_v16 = vpop.f32.mrf.mxu3 }
  0xb8   : > { %v484_v17 = vadd.f32 %v483_v15, %v427_v1  ;;  %v507_v18 = vadd.f32 %v506_v16, %v450_v2  ;;  %v675_v19 = vpop.f32.mrf.mxu0  ;;  %v698_v20 = vpop.f32.mrf.mxu1 }
  0xba   : > { %v511_v21 = vmax.f32 %v484_v17, 0.0  ;;  %v512_v22 = vmax.f32 %v507_v18, 0.0 }
  0xbc   : > { %518 = vst [vmem:[%s1910_s8 + $0x10] sm:$0xff] %v511_v21 }
  0xbd   : > { %519 = vst [vmem:[%s1910_s8 + $0x18] sm:$0xff] %v512_v22 }
  0xbf   : > { %v618_v23 = vpop.f32.mrf.mxu2  ;;  %v641_v24 = vpop.f32.mrf.mxu3 }
  0xc0   : > { %v619_v25 = vadd.f32 %v618_v23, %v365_v51  ;;  %v642_v26 = vadd.f32 %v641_v24, %v388_v52  ;;  %v678_v27 = vpop.f32.mrf.mxu0  ;;  %v701_v28 = vpop.f32.mrf.mxu1 }
  0xc2   : > { %v676_v29 = vadd.f32 %v675_v19, %v619_v25  ;;  %v699_v30 = vadd.f32 %v698_v20, %v642_v26 }
  0xc4   : > { %v704_v31 = vmax.f32 %v676_v29, 0.0  ;;  %v705_v32 = vmax.f32 %v699_v30, 0.0 }
  0xc6   : > { %1391 = vst [vmem:[%s1910_s8 + $0x40] sm:$0xff] %v704_v31 }
  0xc7   : > { %1392 = vst [vmem:[%s1910_s8 + $0x48] sm:$0xff] %v705_v32  ;;  %v621_v33 = vpop.f32.mrf.mxu2  ;;  %v644_v34 = vpop.f32.mrf.mxu3 }
  0xc8   : > { %v622_v35 = vadd.f32 %v621_v33, %v368_v61  ;;  %v645_v36 = vadd.f32 %v644_v34, %v391_v62  ;;  %v817_v37 = vpop.f32.mrf.mxu0  ;;  %v840_v38 = vpop.f32.mrf.mxu1 }
  0xc9   : > { %v818_v61 = vadd.f32 %v817_v37, %v1899_v45  ;;  %v841_v62 = vadd.f32 %v840_v38, %v1901_v46 }
  0xca   : > { %v679_v39 = vadd.f32 %v678_v27, %v622_v35  ;;  %v702_v40 = vadd.f32 %v701_v28, %v645_v36 }
  0xcc   : > { %v706_v41 = vmax.f32 %v679_v39, 0.0  ;;  %v707_v42 = vmax.f32 %v702_v40, 0.0 }
  0xce   : > { %1393 = vst [vmem:[%s1910_s8 + $0x50] sm:$0xff] %v706_v41 }
  0xcf   : > { %1394 = vst [vmem:[%s1910_s8 + $0x58] sm:$0xff] %v707_v42  ;;  %v743_v43 = vpop.f32.mrf.mxu2  ;;  %v766_v44 = vpop.f32.mrf.mxu3 }
  0xd0   : > { %v744_v47 = vadd.f32 %v743_v43, %v619_v25  ;;  %v767_v48 = vadd.f32 %v766_v44, %v642_v26  ;;  %v820_v49 = vpop.f32.mrf.mxu0  ;;  %v843_v50 = vpop.f32.mrf.mxu1 }
  0xd1   : > { %v821_v9 = vadd.f32 %v820_v49, %v1899_v45  ;;  %v844_v10 = vadd.f32 %v843_v50, %v1901_v46 }
  0xd2   : > { %v772_v51 = vmax.f32 %v744_v47, 0.0  ;;  %v773_v52 = vmax.f32 %v767_v48, 0.0 }
  0xd4   : > { %1401 = vst [vmem:[%s1910_s8 + $0x60] sm:$0xff] %v772_v51 }
  0xd5   : > { %1402 = vst [vmem:[%s1910_s8 + $0x68] sm:$0xff] %v773_v52 }
  0xd7   : > { %v746_v53 = vpop.f32.mrf.mxu2  ;;  %v769_v54 = vpop.f32.mrf.mxu3 }
  0xd8   : > { %v747_v55 = vadd.f32 %v746_v53, %v622_v35  ;;  %v770_v56 = vadd.f32 %v769_v54, %v645_v36  ;;  %v933_v57 = vpop.f32.mrf.mxu0  ;;  %v956_v58 = vpop.f32.mrf.mxu1 }
  0xda   : > { %v774_v59 = vmax.f32 %v747_v55, 0.0  ;;  %v775_v60 = vmax.f32 %v770_v56, 0.0 }
  0xdc   : > { %1403 = vst [vmem:[%s1910_s8 + $0x70] sm:$0xff] %v774_v59 }
  0xdd   : > { %1404 = vst [vmem:[%s1910_s8 + $0x78] sm:$0xff] %v775_v60 }
  0xdf   : > { %v876_v63 = vpop.f32.mrf.mxu2  ;;  %v899_v0 = vpop.f32.mrf.mxu3 }
  0xe0   : > { %v877_v1 = vadd.f32 %v876_v63, %v818_v61  ;;  %v900_v2 = vadd.f32 %v899_v0, %v841_v62  ;;  %v936_v3 = vpop.f32.mrf.mxu0  ;;  %v959_v4 = vpop.f32.mrf.mxu1 }
  0xe2   : > { %v934_v5 = vadd.f32 %v933_v57, %v877_v1  ;;  %v957_v6 = vadd.f32 %v956_v58, %v900_v2 }
  0xe4   : > { %v962_v7 = vmax.f32 %v934_v5, 0.0  ;;  %v963_v8 = vmax.f32 %v957_v6, 0.0 }
  0xe6   : > { %1423 = vst [vmem:[%s1910_s8 + $0x80] sm:$0xff] %v962_v7 }
  0xe7   : > { %1424 = vst [vmem:[%s1910_s8 + $0x88] sm:$0xff] %v963_v8  ;;  %v879_v11 = vpop.f32.mrf.mxu2  ;;  %v902_v12 = vpop.f32.mrf.mxu3 }
  0xe8   : > { %v880_v13 = vadd.f32 %v879_v11, %v821_v9  ;;  %v903_v14 = vadd.f32 %v902_v12, %v844_v10  ;;  %v1071_v15 = vpop.f32.mrf.mxu0  ;;  %v1094_v16 = vpop.f32.mrf.mxu1 }
  0xe9   : > { %v1072_v27 = vadd.f32 %v1071_v15, %v818_v61  ;;  %v1095_v28 = vadd.f32 %v1094_v16, %v841_v62 }
  0xea   : > { %v937_v17 = vadd.f32 %v936_v3, %v880_v13  ;;  %v960_v18 = vadd.f32 %v959_v4, %v903_v14 }
  0xec   : > { %v964_v19 = vmax.f32 %v937_v17, 0.0  ;;  %v965_v20 = vmax.f32 %v960_v18, 0.0 }
  0xee   : > { %1425 = vst [vmem:[%s1910_s8 + $0x90] sm:$0xff] %v964_v19 }
  0xef   : > { %1426 = vst [vmem:[%s1910_s8 + $0x98] sm:$0xff] %v965_v20  ;;  %v1001_v21 = vpop.f32.mrf.mxu2  ;;  %v1024_v45 = vpop.f32.mrf.mxu3 }
  0xf0   : > { %v1002_v22 = vadd.f32 %v1001_v21, %v877_v1  ;;  %v1025_v46 = vadd.f32 %v1024_v45, %v900_v2  ;;  %v1074_v23 = vpop.f32.mrf.mxu0  ;;  %v1097_v24 = vpop.f32.mrf.mxu1 }
  0xf1   : > { %v1075_v41 = vadd.f32 %v1074_v23, %v821_v9  ;;  %v1098_v42 = vadd.f32 %v1097_v24, %v844_v10 }
  0xf2   : > { %v1030_v25 = vmax.f32 %v1002_v22, 0.0  ;;  %v1031_v26 = vmax.f32 %v1025_v46, 0.0 }
  0xf4   : > { %1433 = vst [vmem:[%s1910_s8 + $0xa0] sm:$0xff] %v1030_v25 }
  0xf5   : > { %1434 = vst [vmem:[%s1910_s8 + $0xa8] sm:$0xff] %v1031_v26 }
  0xf7   : > { %v1004_v29 = vpop.f32.mrf.mxu2  ;;  %v1027_v30 = vpop.f32.mrf.mxu3 }
  0xf8   : > { %v1005_v31 = vadd.f32 %v1004_v29, %v880_v13  ;;  %v1028_v32 = vadd.f32 %v1027_v30, %v903_v14  ;;  %v1196_v33 = vpop.f32.mrf.mxu0  ;;  %v1219_v34 = vpop.f32.mrf.mxu1 }
  0xf9   : > { %v1197_v35 = vadd.f32 %v1196_v33, %v1072_v27  ;;  %v1220_v36 = vadd.f32 %v1219_v34, %v1095_v28 }
  0xfa   : > { %v1032_v37 = vmax.f32 %v1005_v31, 0.0  ;;  %v1033_v38 = vmax.f32 %v1028_v32, 0.0 }
  0xfb   : > { %v1225_v39 = vmax.f32 %v1197_v35, 0.0  ;;  %v1226_v40 = vmax.f32 %v1220_v36, 0.0 }
  0xfc   : > { %1435 = vst [vmem:[%s1910_s8 + $0xb0] sm:$0xff] %v1032_v37 }
  0xfd   : > { %1436 = vst [vmem:[%s1910_s8 + $0xb8] sm:$0xff] %v1033_v38 }
  0xfe   : > { %1459 = vst [vmem:[%s1910_s8 + $0xe0] sm:$0xff] %v1225_v39 }
  0xff   : > { %1460 = vst [vmem:[%s1910_s8 + $0xe8] sm:$0xff] %v1226_v40  ;;  %v1128_v43 = vpop.f32.mrf.mxu2  ;;  %v1151_v44 = vpop.f32.mrf.mxu3 }
 0x100   : > { %v1129_v47 = vadd.f32 %v1128_v43, %v1072_v27  ;;  %v1152_v48 = vadd.f32 %v1151_v44, %v1095_v28  ;;  %v1199_v49 = vpop.f32.mrf.mxu0  ;;  %v1222_v50 = vpop.f32.mrf.mxu1 }
 0x101   : > { %v1200_v51 = vadd.f32 %v1199_v49, %v1075_v41  ;;  %v1223_v52 = vadd.f32 %v1222_v50, %v1098_v42 }
 0x102   : > { %v1157_v53 = vmax.f32 %v1129_v47, 0.0  ;;  %v1158_v54 = vmax.f32 %v1152_v48, 0.0 }
 0x103   : > { %v1227_v55 = vmax.f32 %v1200_v51, 0.0  ;;  %v1228_v56 = vmax.f32 %v1223_v52, 0.0 }
 0x104   : > { %1449 = vst [vmem:[%s1910_s8 + $0xc0] sm:$0xff] %v1157_v53 }
 0x105   : > { %1450 = vst [vmem:[%s1910_s8 + $0xc8] sm:$0xff] %v1158_v54 }
 0x106   : > { %1461 = vst [vmem:[%s1910_s8 + $0xf0] sm:$0xff] %v1227_v55 }
 0x107   : > { %1462 = vst [vmem:[%s1910_s8 + $0xf8] sm:$0xff] %v1228_v56  ;;  %v1131_v57 = vpop.f32.mrf.mxu2  ;;  %v1154_v58 = vpop.f32.mrf.mxu3 }
 0x108   : > { %v1132_v59 = vadd.f32 %v1131_v57, %v1075_v41  ;;  %v1155_v60 = vadd.f32 %v1154_v58, %v1098_v42 }
 0x10a   : > { %v1159_v61 = vmax.f32 %v1132_v59, 0.0  ;;  %v1160_v62 = vmax.f32 %v1155_v60, 0.0 }
 0x10c   : > { %1451 = vst [vmem:[%s1910_s8 + $0xd0] sm:$0xff] %v1159_v61 }
 0x10d   : > { %1452 = vst [vmem:[%s1910_s8 + $0xd8] sm:$0xff] %v1160_v62 }
 0x10e   : > { %1539 = shalt.err (!%p1536_p7)
}
 0x10f   : > { %s1576_s23 = smov 256   ;;  %s1577_s8 = smov 16  }
 0x110   : > { %1471 = dma.vmem_to_hbm [thread:$0]  (%p1656_p5), %s1251_s14, 4096, %s1253_s28, %s1237_s15, %s1576_s23, %s1576_s23, %s1577_s8  }
 0x111 PF: > { %p1477_p8 = scmp.ge.s32.totalorder %s1574_s27, 2  ;;  %s1267_s9 = sand.u32 1, %s1562_s24  }
 0x112   : > { %s1268_s13 = scalar_lea.sflag [#allocation3], %s1267_s9 }
 0x113   : > { %p1474_p9 = pnand %p1477_p8, %p1660_p6 }
 0x115   : > { %p1475_p10 = pneg %p1474_p9 }
 0x117   : > { %1557 = dma.done.wait (%p1475_p10), %s1268_s13, 4096  }
 0x118   : > { %1559 = vsyncadd (%p1475_p10), %s1268_s13, 4294963200  ;;  %p17_p11 = scmp.ge.s32.totalorder %s1643_s30, 6   ;;  %s1993_s24 = smov %s1566_s25 }
 0x119   : > { %s1994_s25 = smov %s1570_s26  ;;  %s1995_s26 = smov %s1654_s10 }
 0x11a   : > { %s1996_s27 = smov %s1643_s30  ;;  %19 = sbr.rel (!%p17_p11) target bundleno = 3 (0x3), region = 108 }
 0x11f   :  { %1274 = vsyncpa [#allocation3], 1 }
 0x120   :  { %1276 = vsyncpa [#allocation3 + $0x1], 1 }

</bundles_post_ra>
